<compile_context>
chip_gen: v7x
topology: tpu7x:2x2x1
jax: 0.10.0
libtpu: 0.0.40
codegen_flags: <defaults>
</compile_context>

<pallas_src>
import jax
import jax.numpy as jnp
from jax.experimental import pallas as pl
from jax.experimental.pallas import tpu as pltpu

EPS = 1e-6

# Budget for the double-buffered input tile (2 x TILE_NC x HW x itemsize bytes).
# Conservative enough for v7x's 64 MiB VMEM and v5e once vmem_limit_bytes is raised.
_VMEM_INPUT_BUDGET = 24 * 1024 * 1024
_VMEM_LIMIT_BYTES = 48 * 1024 * 1024


def _gem_kernel(scal_ref, x_ref, o_ref):
    # scal_ref : SMEM (2,) f32   -> [p, 1/p]
    # x_ref    : VMEM (TILE_NC, HW), native input dtype
    # o_ref    : VMEM (TILE_NC, 1) f32
    p = scal_ref[0]
    inv_p = scal_ref[1]
    x = x_ref[...].astype(jnp.float32)
    # clamp(min=eps) then x**p  (x >= eps > 0, so exp(p*log(x)) is exact & safe)
    xc = jnp.maximum(x, EPS)
    xp = jnp.exp(p * jnp.log(xc))
    # avg_pool2d over the full spatial extent == mean over the HW (lane) axis
    m = jnp.mean(xp, axis=-1, keepdims=True)
    # final (.)^(1/p)
    o_ref[...] = jnp.exp(jnp.log(m) * inv_p)


def _sublane_multiple(dtype):
    # Sub-32-bit dtypes pack along sublanes: f32 -> 8, bf16 -> 16, 8-bit -> 32.
    itemsize = jnp.dtype(dtype).itemsize
    return 8 * max(1, 4 // itemsize)


def _pick_tile_nc(nc, hw, dtype):
    itemsize = jnp.dtype(dtype).itemsize
    sub = _sublane_multiple(dtype)
    # 2x for BlockSpec double-buffering of the input tile.
    max_rows = _VMEM_INPUT_BUDGET // (2 * hw * itemsize)
    tile = max(sub, (max_rows // sub) * sub)
    # No point tiling wider than the (sublane-padded) row count.
    nc_padded = ((nc + sub - 1) // sub) * sub
    return min(tile, nc_padded)


def gem_pallas(x, p):
    """GeM pooling. x: (N, C, H, W) any float dtype, p: scalar. Returns (N, C, 1, 1) f32."""
    N, C, H, W = x.shape
    NC, HW = N * C, H * W
    x2d = x.reshape(NC, HW)  # keep native dtype; cast to f32 inside the kernel

    tile_nc = _pick_tile_nc(NC, HW, x2d.dtype)
    nc_pad = pl.cdiv(NC, tile_nc) * tile_nc
    if nc_pad != NC:
        # Pad tail rows with a safe positive constant; rows are independent and the
        # padded rows are sliced off below.
        x2d = jnp.pad(x2d, ((0, nc_pad - NC), (0, 0)), constant_values=1.0)

    p_f32 = jnp.asarray(p, jnp.float32).reshape(())
    scal = jnp.stack([p_f32, 1.0 / p_f32])  # [p, 1/p] -> SMEM

    # TODO(synk): for extremely large HW (hundreds of thousands), add an inner
    # "arbitrary" grid axis over HW with a VMEM accumulator instead of shrinking TILE_NC.
    grid = (nc_pad // tile_nc,)
    out2d = pl.pallas_call(
        _gem_kernel,
        out_shape=jax.ShapeDtypeStruct((nc_pad, 1), jnp.float32),
        grid=grid,
        in_specs=[
            pl.BlockSpec(memory_space=pltpu.SMEM),           # [p, 1/p] scalars
            pl.BlockSpec((tile_nc, HW), lambda i: (i, 0)),   # row tile of x
        ],
        out_specs=pl.BlockSpec((tile_nc, 1), lambda i: (i, 0)),
        compiler_params=pltpu.CompilerParams(
            dimension_semantics=("parallel",),   # independent rows -> megacore split
            vmem_limit_bytes=_VMEM_LIMIT_BYTES,
        ),
    )(scal, x2d)

    return out2d[:NC].reshape(N, C, 1, 1)


def gem_reference(x, p):
    xc = jnp.maximum(x.astype(jnp.float32), EPS)
    xp = xc ** p
    m = jnp.mean(xp, axis=(-2, -1), keepdims=True)
    return m ** (1.0 / p)


if __name__ == "__main__":
    key = jax.random.PRNGKey(0)
    # Deterministic parameter init, as in GeM.__init__: p = ones(1) * 3
    p = jnp.float32(3.0)

    N, C, H, W = 2, 4, 16, 16
    x = jax.random.uniform(key, (N, C, H, W), dtype=jnp.float32, minval=0.0, maxval=2.0)

    out = gem_pallas(x, p)
    out = jax.block_until_ready(out)

    ref = gem_reference(x, p)
    assert out.shape == (N, C, 1, 1), out.shape
    assert jnp.allclose(out, ref, rtol=1e-4, atol=1e-5), (out, ref)

    print("KERNEL_OK")
</pallas_src>

<mosaic_0001>
module attributes {stable_mosaic.version = 11 : i64} {
  func.func @_gem_kernel(%arg0: i32, %arg1: memref<2xf32, #tpu.memory_space<smem>>, %arg2: memref<8x256xf32, #tpu.memory_space<vmem>>, %arg3: memref<8x1xf32, #tpu.memory_space<vmem>>) attributes {dimension_semantics = [#tpu.dimension_semantics<parallel>], iteration_bounds = array<i64: 1>, scalar_prefetch = 0 : i64, scratch_operands = 0 : i64, tpu.core_type = #tpu.core_type<tc>, window_params = [{transform_indices = @transform_0, window_bounds = array<i64: 2>}, {transform_indices = @transform_1, window_bounds = array<i64: 8, 256>}, {transform_indices = @transform_2, window_bounds = array<i64: 8, 1>}]} {
    %c0 = arith.constant 0 : index
    %0 = memref.load %arg1[%c0] : memref<2xf32, #tpu.memory_space<smem>>
    %c1 = arith.constant 1 : index
    %1 = memref.load %arg1[%c1] : memref<2xf32, #tpu.memory_space<smem>>
    %c0_0 = arith.constant 0 : index
    %c0_1 = arith.constant 0 : index
    %2 = vector.load %arg2[%c0_0, %c0_1] : memref<8x256xf32, #tpu.memory_space<vmem>>, vector<8x256xf32>
    %cst = arith.constant 9.99999997E-7 : f32
    %3 = vector.broadcast %cst : f32 to vector<8x256xf32>
    %4 = arith.maximumf %2, %3 : vector<8x256xf32>
    %5 = math.log %4 : vector<8x256xf32>
    %6 = vector.broadcast %0 : f32 to vector<8x256xf32>
    %7 = arith.mulf %6, %5 : vector<8x256xf32>
    %8 = math.exp %7 : vector<8x256xf32>
    %cst_2 = arith.constant dense<0.000000e+00> : vector<8xf32>
    %9 = vector.multi_reduction <add>, %8, %cst_2 [1] : vector<8x256xf32> to vector<8xf32>
    %10 = vector.shape_cast %9 : vector<8xf32> to vector<8x1xf32>
    %cst_3 = arith.constant 2.560000e+02 : f32
    %11 = vector.broadcast %cst_3 : f32 to vector<8x1xf32>
    %12 = arith.divf %10, %11 : vector<8x1xf32>
    %13 = math.log %12 : vector<8x1xf32>
    %14 = vector.broadcast %1 : f32 to vector<8x1xf32>
    %15 = arith.mulf %13, %14 : vector<8x1xf32>
    %16 = math.exp %15 : vector<8x1xf32>
    %c0_4 = arith.constant 0 : index
    %c0_5 = arith.constant 0 : index
    %17 = vector.load %arg3[%c0_4, %c0_5] : memref<8x1xf32, #tpu.memory_space<vmem>>, vector<8x1xf32>
    tpu.vector_store %arg3[%c0_4, %c0_5], %16 {strides = array<i32>} : memref<8x1xf32, #tpu.memory_space<vmem>>, vector<8x1xf32>,
    return
  }
  func.func @transform_0(%arg0: i32) -> i32 {
    %c0_i32 = arith.constant 0 : i32
    %c0_i32_0 = arith.constant 0 : i32
    return %c0_i32 : i32
  }
  func.func @transform_1(%arg0: i32) -> (i32, i32) {
    %c0_i32 = arith.constant 0 : i32
    %c0_i32_0 = arith.constant 0 : i32
    return %arg0, %c0_i32 : i32, i32
  }
  func.func @transform_2(%arg0: i32) -> (i32, i32) {
    %c0_i32 = arith.constant 0 : i32
    %c0_i32_0 = arith.constant 0 : i32
    return %arg0, %c0_i32 : i32, i32
  }
}

</mosaic_0001>

<bundles_post_ra>
// kernel: tpu_custom_call.1
= control target key start
LH: loop header
LB: loop body
LE: loop exit
PB: predicated region body
PF: predicated region fallthrough
CT: control target
= control target key end

     0   :  { %7 = vsyncpa [#allocation4], 0  ;;  %s165_s0 = inlined_call_operand.hbm [shape: f32[2], index: 0, kind: input, shape index: {}]   ;;  %s166_s1 = inlined_call_operand.hbm [shape: f32[8,256], index: 1, kind: input, shape index: {}]   ;;  %s167_s2 = inlined_call_operand.vmem [shape: f32[8,1], index: 2, kind: output, shape index: {}]  }
   0x1   :  { %8 = vsyncpa [#allocation3], 0  ;;  %s85_s11 = scalar_lea.hbm %s165_s0, 16 }
   0x2   :  { %p86_p0 = scmp.ne.s32.totalorder %s165_s0, %s85_s11  ;;  %p89_p1 = scmp.lt.u32.totalorder %s85_s11, %s165_s0 }
   0x4   :  { %p91_p2 = pnand %p89_p1, %p86_p0 }
   0x6   :  { %94 = shalt.err (!%p91_p2)
}
   0x7   :  { %s121_s16 = smov [#allocation2]   ;;  %s122_s19 = smov [#allocation5]  }
   0x8   :  { %16 = dma.hbm_to_smem %s165_s0, 16, %s121_s16, [#allocation4]  }
   0x9   :  { %s23_s20 = sshll.u32 %s122_s19, 4  ;;  %s95_s23 = scalar_lea.hbm %s166_s1, 256  ;;  %s24_s20 = int_to_ptr.vmem [resolvable:$true] %s23_s20 }
   0xa   :  { %p96_p3 = scmp.ne.s32.totalorder %s166_s1, %s95_s23  ;;  %p99_p4 = scmp.lt.u32.totalorder %s95_s23, %s166_s1 }
   0xc   :  { %p101_p5 = pnand %p99_p4, %p96_p3 }
   0xe   :  { %104 = shalt.err (!%p101_p5)
}
   0xf   :  { %s105_s28 = scalar_lea.vmem %s24_s20, 256  ;;  %p110_p7 = scmp.lt.s32.totalorder %s24_s20, %s24_s20 }
  0x10   :  { %p106_p6 = scmp.ne.s32.totalorder %s24_s20, %s105_s28  ;;  %p111_p8 = scmp.lt.s32.totalorder %s105_s28, %s105_s28 }
  0x12   :  { %p112_p9 = por %p111_p8, %p110_p7 }
  0x14   :  { %p113_p10 = pnand %p112_p9, %p106_p6 }
  0x16   :  { %116 = shalt.err (!%p113_p10)
}
  0x17   :  { %26 = dma.hbm_to_vmem [thread:$0]  %s166_s1, 256, %s24_s20, [#allocation3]  }
  0x18   :  { %117 = dma.done.wait [#allocation4], 16  }
  0x19   :  { %118 = vsyncadd [#allocation4], 4294967280 }
  0x1a   :  { %119 = dma.done.wait [#allocation3], 256  }
  0x1b   :  { %120 = vsyncadd [#allocation3], 4294967040 }
  0x1c   :  { %33 = sfence }
  0x1d   :  { %v36_v0 = vld [vmem:[#allocation5] sm:$0xff]  ;;  %v37_v1 = vld [vmem:[#allocation5 + $0x8] sm:$0xff]  ;;  %s34_s30 = sld [smem:[#allocation2]]  ;;  %s70_s1 = sld [smem:[#allocation2 + $0x1]]  ;;  %vm62_vm0 = vcmask 7168  }
  0x1e   :  { %v38_v2 = vmax.f32 %v36_v0, 1e-06  ;;  %v39_v3 = vmax.f32 %v37_v1, 1e-06 }
  0x20   :  { %73 = vlog2.f32 %v38_v2 }
  0x21   :  { %75 = vlog2.f32 %v39_v3 }
  0x23   :  { %v44_v5 = vstv %s34_s30  ;;  %v58_v19 = vstv %s70_s1 }
  0x2a   :  { %v74_v4 = vpop.eup %73 }
  0x2b   :  { %v76_v6 = vpop.eup %75  ;;  %v41_v7 = vmul.f32 0.6931472, %v74_v4 }
  0x2c   :  { %v43_v8 = vmul.f32 0.6931472, %v76_v6 }
  0x2d   :  { %v45_v9 = vmul.f32 %v44_v5, %v41_v7 }
  0x2e   :  { %v46_v10 = vmul.f32 %v44_v5, %v43_v8 }
  0x2f   :  { %v47_v11 = vmul.f32 1.442695, %v45_v9 }
  0x30   :  { %v49_v12 = vmul.f32 1.442695, %v46_v10 }
  0x31   :  { %77 = vpow2.f32 %v47_v11 }
  0x32   :  { %79 = vpow2.f32 %v49_v12 }
  0x3b   :  { %v78_v13 = vpop.eup %77 }
  0x3c   :  { %v80_v14 = vpop.eup %79 }
  0x3d   :  { %v51_v15 = vadd.f32 %v80_v14, %v78_v13 }
  0x3f   :  { %52 = vadd.xlane.f32.xlu0 %v51_v15 }
  0xcc   :  { %v53_v16 = vpop.xlane.xlu0 %52 }
  0xcd   :  { %v55_v17 = vmul.f32 0.00390625, %v53_v16 }
  0xcf   :  { %81 = vlog2.f32 %v55_v17 }
  0xd9   :  { %v82_v18 = vpop.eup %81 }
  0xda   :  { %v57_v20 = vmul.f32 0.6931472, %v82_v18 }
  0xdc   :  { %v59_v21 = vmul.f32 %v58_v19, %v57_v20 }
  0xde   :  { %v60_v22 = vmul.f32 1.442695, %v59_v21 }
  0xe0   :  { %83 = vpow2.f32 %v60_v22 }
  0xea   :  { %v84_v23 = vpop.eup %83 }
  0xeb   :  { %63 = vst.msk [vmem:[%s167_s2] sm:$0xff] %vm62_vm0, %v84_v23 }
  0xec   :  { %68 = vsyncpa [#allocation3], 1 }
  0xed   :  { %69 = vsyncpa [#allocation4], 1 }

</bundles_post_ra>
